<compile_context>
chip_gen: v5e
topology: v5e:2x2
jax: 0.10.0
libtpu: 0.0.40
codegen_flags: <defaults>
</compile_context>

<pallas_src>
import functools
import math

import jax
import jax.numpy as jnp
from jax.experimental import pallas as pl
from jax.experimental.pallas import tpu as pltpu


def factor_predictor_kernel(e_ref, w_ref, b_ref, head_ref, out_ref, *,
                            num_heads, hidden, approx_recip):
    # e_ref    : (N, D)            stock latent features (stocks on sublanes here)
    # w_ref    : (Kpad + K*H, D)   rows [0:K]   = query-folded, pre-scaled key weights
    #                              rows [Kpad:] = flattened value weights
    # b_ref    : (Kpad + K*H, 1)   matching (folded / flattened) biases, always f32
    # head_ref : (H+1, 2)          rows [0:H] = [mu_w | sg_w], row [H] = [mu_b | sg_b]
    # out_ref  : (K, 2)            column 0 = mu_prior, column 1 = sigma_prior
    kpad = w_ref.shape[0] - num_heads * hidden

    w = w_ref[...]
    e = e_ref[...]

    # One fused MXU projection for all heads, NT form: (Kpad+K*H, D) x (N, D)^T
    # -> (Kpad+K*H, N).  Stocks land on the lane axis; no wrapper-side transpose of e.
    proj = jax.lax.dot_general(
        w, e.astype(w.dtype), (((1,), (1,)), ((), ())),
        preferred_element_type=jnp.float32) + b_ref[...]

    logits = proj[0:num_heads, :]            # (K, N); q.k / sqrt(H) folded at pack time
    vp = proj[kpad:, :]                      # (K*H, N)

    # Numerically stable softmax over the N stocks (lane reduction), kept in f32.
    m = jnp.max(logits, axis=-1, keepdims=True)
    p = jnp.exp(logits - m)
    denom = jnp.sum(p, axis=-1, keepdims=True)
    attn = p * pl.reciprocal(denom, approx=approx_recip)               # (K, N)

    # All heads' attention-weighted sums in ONE MXU op:
    # (K, N) x (K*H, N)^T -> (K, K*H); head k's h_att is full[k, k*H:(k+1)*H].
    full = jax.lax.dot_general(attn, vp, (((1,), (1,)), ((), ())),
                               preferred_element_type=jnp.float32)     # (K, K*H)
    h_multi = jnp.concatenate(
        [full[k:k + 1, k * hidden:(k + 1) * hidden] for k in range(num_heads)],
        axis=0)                              # (K, H), built in vregs (no VMEM scratch)

    # Fused distribution network: one (K,H)x(H,2) matmul; exp only on the sigma column.
    head_w = head_ref[0:hidden, :]                                      # (H, 2)
    head_b = head_ref[hidden:hidden + 1, :]                             # (1, 2)
    out = jnp.dot(h_multi, head_w, preferred_element_type=jnp.float32) + head_b  # (K, 2)
    out_ref[:, 0:1] = out[:, 0:1]
    out_ref[:, 1:2] = jnp.exp(out[:, 1:2])


def pack_params(p, precision="float32"):
    """One-time parameter repacking (done at init time, not per call)."""
    Wk, bk, Wv, bv, Q = p["Wk"], p["bk"], p["Wv"], p["bv"], p["Q"]
    K, D, H = Wk.shape
    kpad = ((K + 7) // 8) * 8                       # keep the value-row slice aligned
    scale = 1.0 / math.sqrt(H)

    # Fold the query into the key weights:  logits = wq_t @ e^T + bq
    wq_t = jnp.sum(Wk * Q[:, None, :], axis=-1) * scale          # (K, D)
    bq = jnp.sum(bk * Q, axis=-1, keepdims=True) * scale         # (K, 1)

    # Flatten value weights: row k*H + h corresponds to Wv[k, :, h].
    wv_t = jnp.transpose(Wv, (0, 2, 1)).reshape(K * H, D)        # (K*H, D)
    bv_t = bv.reshape(K * H, 1)                                  # (K*H, 1)

    pad_w = jnp.zeros((kpad - K, D), jnp.float32)
    pad_b = jnp.zeros((kpad - K, 1), jnp.float32)
    w_all = jnp.concatenate([wq_t, pad_w, wv_t], axis=0)         # (kpad + K*H, D)
    b_all = jnp.concatenate([bq, pad_b, bv_t], axis=0)           # (kpad + K*H, 1)

    # Distribution-network head packed into a single buffer: rows [0:H] weights, row H bias.
    head_all = jnp.concatenate(
        [jnp.concatenate([p["mu_w"], p["sg_w"]], axis=1),        # (H, 2)
         jnp.concatenate([p["mu_b"], p["sg_b"]], axis=1)],       # (1, 2)
        axis=0)                                                  # (H+1, 2)

    if precision == "bfloat16":
        # bf16 MXU inputs for the big projection only; biases + epilogue stay f32.
        # (On v7x a further quantization step should target fp8, not int8: no int MXU.)
        w_all = w_all.astype(jnp.bfloat16)

    return dict(w_all=w_all, b_all=b_all, head_all=head_all,
                latent_size=K, hidden_size=H)


def factor_predictor(e, packed):
    """Wrapper: e is (N, D). Returns (mu_prior, sigma_prior), each shape (K,)."""
    K, H = packed["latent_size"], packed["hidden_size"]
    w_all, b_all, head_all = packed["w_all"], packed["b_all"], packed["head_all"]
    N, D = e.shape
    rows = w_all.shape[0]

    flops = 2 * rows * D * N + 2 * K * (K * H) * N + 2 * K * H * 2
    transcendentals = K * N + K
    bytes_accessed = (e.size * e.dtype.itemsize
                      + w_all.size * w_all.dtype.itemsize
                      + b_all.size * b_all.dtype.itemsize
                      + head_all.size * head_all.dtype.itemsize
                      + K * 2 * 4)

    kern = functools.partial(factor_predictor_kernel,
                             num_heads=K, hidden=H,
                             approx_recip=(w_all.dtype == jnp.bfloat16))
    out = pl.pallas_call(
        kern,
        out_shape=jax.ShapeDtypeStruct((K, 2), jnp.float32),
        in_specs=[pl.BlockSpec(memory_space=pltpu.MemorySpace.VMEM) for _ in range(4)],
        out_specs=pl.BlockSpec(memory_space=pltpu.MemorySpace.VMEM),
        cost_estimate=pl.CostEstimate(flops=flops,
                                      transcendentals=transcendentals,
                                      bytes_accessed=bytes_accessed),
        compiler_params=pltpu.CompilerParams(vmem_limit_bytes=32 * 1024 * 1024),
    )(e, w_all, b_all, head_all)
    return out[:, 0], out[:, 1]


def init_params(key, input_size, hidden_size, latent_size):
    """Deterministic synthetic init mirroring the torch module's parameter shapes."""
    D, H, K = input_size, hidden_size, latent_size
    ks = jax.random.split(key, 9)

    def lin(k, fan_in, shape):           # nn.Linear-style uniform(-1/sqrt(fan_in), ...)
        b = 1.0 / math.sqrt(fan_in)
        return jax.random.uniform(k, shape, jnp.float32, -b, b)

    return dict(
        Wk=lin(ks[0], D, (K, D, H)),     # w_key.weight^T per head
        bk=lin(ks[1], D, (K, H)),
        Wv=lin(ks[2], D, (K, D, H)),     # w_value.weight^T per head
        bv=lin(ks[3], D, (K, H)),
        Q=jax.random.normal(ks[4], (K, H), jnp.float32),   # torch.randn query per head
        mu_w=lin(ks[5], H, (H, 1)),
        mu_b=lin(ks[6], H, (1, 1)),
        sg_w=lin(ks[7], H, (H, 1)),
        sg_b=lin(ks[8], H, (1, 1)),
    )


def reference(e, p):
    """Pure-JAX reimplementation of the torch forward pass (for validation)."""
    K, H = p["Q"].shape
    heads = []
    for k in range(K):
        kp = e @ p["Wk"][k] + p["bk"][k]
        logits = (kp @ p["Q"][k]) / math.sqrt(H)
        attn = jax.nn.softmax(logits, axis=-1)
        vp = e @ p["Wv"][k] + p["bv"][k]
        heads.append(attn @ vp)
    h = jnp.stack(heads, axis=0)                       # (K, H)
    mu = (h @ p["mu_w"] + p["mu_b"])[:, 0]
    sg = jnp.exp(h @ p["sg_w"] + p["sg_b"])[:, 0]
    return mu, sg


if __name__ == "__main__":
    N, input_size, hidden_size, latent_size = 8, 16, 32, 4

    key = jax.random.PRNGKey(0)
    k_e, k_p = jax.random.split(key)
    e = jax.random.normal(k_e, (N, input_size), jnp.float32)
    raw = init_params(k_p, input_size, hidden_size, latent_size)
    mu_ref, sg_ref = reference(e, raw)

    # float32 path (exact reciprocal): tight check.  Tolerance 1e-4 (not 1e-5) because the
    # query fold reassociates the key contraction relative to the per-head reference.
    packed = pack_params(raw, precision="float32")
    mu, sigma = factor_predictor(e, packed)
    jax.block_until_ready((mu, sigma))
    assert mu.shape == (latent_size,) and sigma.shape == (latent_size,)
    assert jnp.allclose(mu, mu_ref, atol=1e-4, rtol=1e-4)
    assert jnp.allclose(sigma, sg_ref, atol=1e-4, rtol=1e-4)

    # bfloat16-weight fast path (bf16 MXU inputs + EUP approx reciprocal, f32 epilogue).
    # Note: bf16 error in attn/h_multi is amplified by the final exp for sigma_prior; use
    # the f32 path if sigma precision matters downstream.
    packed_bf16 = pack_params(raw, precision="bfloat16")
    mu16, sg16 = factor_predictor(e, packed_bf16)
    jax.block_until_ready((mu16, sg16))
    assert jnp.allclose(mu16, mu_ref, atol=1e-1, rtol=1e-1)
    assert jnp.allclose(sg16, sg_ref, atol=1e-1, rtol=1e-1)

    print("KERNEL_OK")
</pallas_src>

<mosaic_0001>
module attributes {stable_mosaic.version = 11 : i64} {
  func.func @factor_predictor_kernel(%arg0: memref<8x16xf32, #tpu.memory_space<vmem>>, %arg1: memref<136x16xf32, #tpu.memory_space<vmem>>, %arg2: memref<136x1xf32, #tpu.memory_space<vmem>>, %arg3: memref<33x2xf32, #tpu.memory_space<vmem>>, %arg4: memref<4x2xf32, #tpu.memory_space<vmem>>) attributes {dimension_semantics = [], scalar_prefetch = 0 : i64, scratch_operands = 0 : i64, tpu.core_type = #tpu.core_type<tc>} {
    %c0 = arith.constant 0 : index
    %c0_0 = arith.constant 0 : index
    %0 = vector.load %arg1[%c0, %c0_0] : memref<136x16xf32, #tpu.memory_space<vmem>>, vector<136x16xf32>
    %c0_1 = arith.constant 0 : index
    %c0_2 = arith.constant 0 : index
    %1 = vector.load %arg0[%c0_1, %c0_2] : memref<8x16xf32, #tpu.memory_space<vmem>>, vector<8x16xf32>
    %cst = arith.constant dense<0.000000e+00> : vector<136x8xf32>
    %2 = tpu.matmul %0, %1, %cst {dimension_numbers = #tpu.dot_dimension_numbers<[1], [1], [0], [0], [0, 0, 1, 0], [], []>} : vector<136x16xf32>, vector<8x16xf32>, vector<136x8xf32> -> vector<136x8xf32>
    %c0_3 = arith.constant 0 : index
    %c0_4 = arith.constant 0 : index
    %3 = vector.load %arg2[%c0_3, %c0_4] : memref<136x1xf32, #tpu.memory_space<vmem>>, vector<136x1xf32>
    %4 = vector.broadcast %3 : vector<136x1xf32> to vector<136x8xf32>
    %5 = arith.addf %2, %4 : vector<136x8xf32>
    %6 = vector.extract_strided_slice %5 {offsets = [0, 0], sizes = [4, 8], strides = [1, 1]} : vector<136x8xf32> to vector<4x8xf32>
    %7 = vector.extract_strided_slice %5 {offsets = [8, 0], sizes = [128, 8], strides = [1, 1]} : vector<136x8xf32> to vector<128x8xf32>
    %cst_5 = arith.constant dense<0xFF800000> : vector<4xf32>
    %8 = vector.multi_reduction <maximumf>, %6, %cst_5 [1] : vector<4x8xf32> to vector<4xf32>
    %9 = vector.shape_cast %8 : vector<4xf32> to vector<4x1xf32>
    %10 = vector.broadcast %9 : vector<4x1xf32> to vector<4x8xf32>
    %11 = arith.subf %6, %10 : vector<4x8xf32>
    %12 = math.exp %11 : vector<4x8xf32>
    %cst_6 = arith.constant dense<0.000000e+00> : vector<4xf32>
    %13 = vector.multi_reduction <add>, %12, %cst_6 [1] : vector<4x8xf32> to vector<4xf32>
    %14 = vector.shape_cast %13 : vector<4xf32> to vector<4x1xf32>
    %15 = tpu.reciprocal %14 : vector<4x1xf32> -> vector<4x1xf32>
    %16 = vector.broadcast %15 : vector<4x1xf32> to vector<4x8xf32>
    %17 = arith.mulf %12, %16 : vector<4x8xf32>
    %cst_7 = arith.constant dense<0.000000e+00> : vector<4x128xf32>
    %18 = tpu.matmul %17, %7, %cst_7 {dimension_numbers = #tpu.dot_dimension_numbers<[1], [1], [0], [0], [0, 0, 1, 0], [], []>} : vector<4x8xf32>, vector<128x8xf32>, vector<4x128xf32> -> vector<4x128xf32>
    %19 = vector.extract_strided_slice %18 {offsets = [0, 0], sizes = [1, 32], strides = [1, 1]} : vector<4x128xf32> to vector<1x32xf32>
    %20 = vector.extract_strided_slice %18 {offsets = [1, 32], sizes = [1, 32], strides = [1, 1]} : vector<4x128xf32> to vector<1x32xf32>
    %21 = vector.extract_strided_slice %18 {offsets = [2, 64], sizes = [1, 32], strides = [1, 1]} : vector<4x128xf32> to vector<1x32xf32>
    %22 = vector.extract_strided_slice %18 {offsets = [3, 96], sizes = [1, 32], strides = [1, 1]} : vector<4x128xf32> to vector<1x32xf32>
    %23 = tpu.concatenate %19, %20, %21, %22 in 0 : vector<1x32xf32>, vector<1x32xf32>, vector<1x32xf32>, vector<1x32xf32> -> vector<4x32xf32>
    %c0_8 = arith.constant 0 : index
    %c0_9 = arith.constant 0 : index
    %24 = vector.load %arg3[%c0_8, %c0_9] : memref<33x2xf32, #tpu.memory_space<vmem>>, vector<32x2xf32>
    %c32 = arith.constant 32 : index
    %c0_10 = arith.constant 0 : index
    %25 = vector.load %arg3[%c32, %c0_10] : memref<33x2xf32, #tpu.memory_space<vmem>>, vector<1x2xf32>
    %cst_11 = arith.constant dense<0.000000e+00> : vector<4x2xf32>
    %26 = tpu.matmul %23, %24, %cst_11 {dimension_numbers = #tpu.dot_dimension_numbers<[1], [0], [0], [1], [0, 0, 1, 1], [], []>} : vector<4x32xf32>, vector<32x2xf32>, vector<4x2xf32> -> vector<4x2xf32>
    %27 = vector.broadcast %25 : vector<1x2xf32> to vector<4x2xf32>
    %28 = arith.addf %26, %27 : vector<4x2xf32>
    %29 = vector.extract_strided_slice %28 {offsets = [0, 0], sizes = [4, 1], strides = [1, 1]} : vector<4x2xf32> to vector<4x1xf32>
    %c0_12 = arith.constant 0 : index
    %c0_13 = arith.constant 0 : index
    %30 = vector.load %arg4[%c0_12, %c0_13] : memref<4x2xf32, #tpu.memory_space<vmem>>, vector<4x1xf32>
    tpu.vector_store %arg4[%c0_12, %c0_13], %29 {strides = array<i32>} : memref<4x2xf32, #tpu.memory_space<vmem>>, vector<4x1xf32>,
    %31 = vector.extract_strided_slice %28 {offsets = [0, 1], sizes = [4, 1], strides = [1, 1]} : vector<4x2xf32> to vector<4x1xf32>
    %32 = math.exp %31 : vector<4x1xf32>
    %c0_14 = arith.constant 0 : index
    %c1 = arith.constant 1 : index
    %33 = vector.load %arg4[%c0_14, %c1] : memref<4x2xf32, #tpu.memory_space<vmem>>, vector<4x1xf32>
    tpu.vector_store %arg4[%c0_14, %c1], %32 {strides = array<i32>} : memref<4x2xf32, #tpu.memory_space<vmem>>, vector<4x1xf32>,
    return
  }
}

</mosaic_0001>

<bundles_post_ra>
// kernel: tpu_custom_call.1
= control target key start
LH: loop header
LB: loop body
LE: loop exit
PB: predicated region body
PF: predicated region fallthrough
CT: control target
= control target key end

     0   :  { %vm137_vm0 = vcmask 130048   ;;  %v465_v1 = vmov 0   ;;  %vm260_vm1 = vcmask 60416   ;;  %vm285_vm2 = vcmask 64512   ;;  %s467_s29 = smov 96   ;;  %s468_s30 = smov 32   ;;  %s666_s0 = inlined_call_operand.vmem [shape: f32[8,16], index: 0, kind: input, shape index: {}]   ;;  %s667_s1 = inlined_call_operand.vmem [shape: f32[136,16], index: 1, kind: input, shape index: {}]   ;;  %s668_s2 = inlined_call_operand.vmem [shape: f32[136,1], index: 2, kind: input, shape index: {}]   ;;  %s669_s3 = inlined_call_operand.vmem [shape: f32[33,2], index: 3, kind: input, shape index: {}]   ;;  %s670_s4 = inlined_call_operand.vmem [shape: f32[4,2], index: 4, kind: output, shape index: {}]  }
   0x1   :  { %v34_v0 = vld [vmem:[%s666_s0] sm:$0xff]  ;;  %455 = vset.pattern.permute.xlu0 %v465_v1  ;;  %456 = vset.pattern.permute.xlu1 %v465_v1  ;;  %v27_v4 = vld [vmem:[%s667_s1 + $0x50] sm:$0xff]  ;;  %v28_v5 = vld [vmem:[%s667_s1 + $0x58] sm:$0xff]  ;;  %vm367_vm7 = vcmask 1040384   ;;  %vm369_vm8 = vcmask 1041408   ;;  %vm371_vm9 = vcmask 1042432  }
   0x2   :  { %v35_v2 = vld [vmem:[%s668_s2] sm:$0xff]  ;;  %413 = vmatpush.xpose.msk.msra.mxu0 %vm137_vm0, %v34_v0  ;;  %450 = vmatpush.xpose.msk.msra.mxu3 %vm137_vm0, %v34_v0  ;;  %v18_v7 = vld [vmem:[%s667_s1 + $0x8] sm:$0xff]  ;;  %v24_v8 = vld [vmem:[%s667_s1 + $0x38] sm:$0xff]  ;;  %vm379_vm10 = vcmask 261120   ;;  %vm403_vm11 = vcmask 3072   ;;  %vm407_vm12 = vcmask 11272  }
   0x3   :  { %v17_v3 = vld [vmem:[%s667_s1] sm:$0xff]  ;;  %54 = vperm.xlu0 %455, %v35_v2   ;;  %449 = vmatpush.xpose.msk.msra.mxu2 %vm137_vm0, %v34_v0  ;;  %v49_v10 = vld [vmem:[%s668_s2 + $0x70] sm:$0xff]  ;;  %v30_v11 = vld [vmem:[%s667_s1 + $0x68] sm:$0xff] }
   0x4   :  { %457 = vset.pattern.permute.xlu2 %v465_v1  ;;  %v29_v6 = vld [vmem:[%s667_s1 + $0x60] sm:$0xff]  ;;  %v19_v12 = vld [vmem:[%s667_s1 + $0x10] sm:$0xff]  ;;  %v50_v14 = vld [vmem:[%s668_s2 + $0x78] sm:$0xff] }
   0x5   :  { %414 = vmatmul.msk.f32.vlgmr.msra.gmra.mxu0 %vm137_vm0, %v17_v3  ;;  %424 = vmatmul.msk.f32.vlgmr.msra.gmra.mxu3 %vm137_vm0, %v27_v4  ;;  %v51_v9 = vld [vmem:[%s668_s2 + $0x80] sm:$0xff]  ;;  %v31_v15 = vld [vmem:[%s667_s1 + $0x70] sm:$0xff]  ;;  %v20_v16 = vld [vmem:[%s667_s1 + $0x18] sm:$0xff] }
   0x6   :  { %421 = vmatmul.msk.f32.vlgmr.msra.gmra.mxu2 %vm137_vm0, %v24_v8  ;;  %134 = vperm.xlu1 %456, %v51_v9   ;;  %v25_v13 = vld [vmem:[%s667_s1 + $0x40] sm:$0xff]  ;;  %v26_v17 = vld [vmem:[%s667_s1 + $0x48] sm:$0xff]  ;;  %v32_v19 = vld [vmem:[%s667_s1 + $0x78] sm:$0xff] }
   0x7   :  { %124 = vperm.xlu2 %457, %v49_v10   ;;  %v47_v18 = vld [vmem:[%s668_s2 + $0x60] sm:$0xff]  ;;  %v45_v21 = vld [vmem:[%s668_s2 + $0x50] sm:$0xff]  ;;  %v22_v23 = vld [vmem:[%s667_s1 + $0x28] sm:$0xff] }
   0x8   :  { %v21_v20 = vld [vmem:[%s667_s1 + $0x20] sm:$0xff]  ;;  %v23_v24 = vld [vmem:[%s667_s1 + $0x30] sm:$0xff]  ;;  %v48_v25 = vld [vmem:[%s668_s2 + $0x68] sm:$0xff] }
   0x9   :  { %v33_v22 = vld [vmem:[%s667_s1 + $0x80] sm:$0xff]  ;;  %v46_v27 = vld [vmem:[%s668_s2 + $0x58] sm:$0xff]  ;;  %v41_v28 = vld [vmem:[%s668_s2 + $0x30] sm:$0xff] }
   0xa   :  { %v43_v26 = vld [vmem:[%s668_s2 + $0x40] sm:$0xff]  ;;  %v44_v29 = vld [vmem:[%s668_s2 + $0x48] sm:$0xff]  ;;  %v42_v30 = vld [vmem:[%s668_s2 + $0x38] sm:$0xff] }
   0xb   :  { %v40_v32 = vld [vmem:[%s668_s2 + $0x28] sm:$0xff]  ;;  %v39_v37 = vld [vmem:[%s668_s2 + $0x20] sm:$0xff]  ;;  %v38_v39 = vld [vmem:[%s668_s2 + $0x18] sm:$0xff] }
   0xc   :  { %v37_v42 = vld [vmem:[%s668_s2 + $0x10] sm:$0xff]  ;;  %v36_v44 = vld [vmem:[%s668_s2 + $0x8] sm:$0xff]  ;;  %s466_s2 = smov 64  }
   0xd   :  { %425 = vmatmul.msk.f32.gmra.mxu3 %vm137_vm0, %v28_v5  ;;  %415 = vmatmul.msk.f32.gmra.mxu0 %vm137_vm0, %v18_v7 }
   0xe   :  { %422 = vmatmul.msk.f32.gmra.mxu2 %vm137_vm0, %v25_v13  ;;  %129 = vperm.xlu1 %456, %v50_v14  }
   0xf   :  { %119 = vperm.xlu2 %457, %v48_v25  }
  0x15   :  { %426 = vmatmul.msk.f32.gmra.mxu3 %vm137_vm0, %v29_v6  ;;  %416 = vmatmul.msk.f32.gmra.mxu0 %vm137_vm0, %v19_v12 }
  0x16   :  { %423 = vmatmul.msk.f32.gmra.mxu2 %vm137_vm0, %v26_v17  ;;  %114 = vperm.xlu1 %456, %v47_v18  }
  0x17   :  { %109 = vperm.xlu2 %457, %v46_v27  }
  0x1d   :  { %427 = vmatmul.msk.f32.gmra.mxu3 %vm137_vm0, %v30_v11  ;;  %417 = vmatmul.msk.f32.gmra.mxu0 %vm137_vm0, %v20_v16 }
  0x1e   :  { %104 = vperm.xlu1 %456, %v45_v21  }
  0x1f   :  { %99 = vperm.xlu2 %457, %v44_v29  }
  0x25   :  { %428 = vmatmul.msk.f32.gmra.mxu3 %vm137_vm0, %v31_v15  ;;  %418 = vmatmul.msk.f32.gmra.mxu0 %vm137_vm0, %v21_v20 }
  0x26   :  { %94 = vperm.xlu1 %456, %v43_v26  }
  0x27   :  { %89 = vperm.xlu2 %457, %v42_v30  }
  0x2d   :  { %429 = vmatmul.msk.f32.gmra.mxu3 %vm137_vm0, %v32_v19  ;;  %419 = vmatmul.msk.f32.gmra.mxu0 %vm137_vm0, %v22_v23 }
  0x2e   :  { %84 = vperm.xlu1 %456, %v41_v28  }
  0x2f   :  { %79 = vperm.xlu2 %457, %v40_v32  }
  0x35   :  { %430 = vmatmul.msk.f32.gmra.mxu3 %vm137_vm0, %v33_v22  ;;  %420 = vmatmul.msk.f32.gmra.mxu0 %vm137_vm0, %v23_v24 }
  0x37   :  { %74 = vperm.xlu2 %457, %v39_v37  }
  0x3f   :  { %64 = vperm.xlu2 %457, %v37_v42   ;;  %v376_v42 = vld [vmem:[%s669_s3 + $0x18] sm:$0xff] }
  0x40   :  { %395 = vmatpush.msrb.mxu2 %v376_v42 }
  0x47   :  { %59 = vperm.xlu2 %457, %v36_v44   ;;  %v374_v44 = vld [vmem:[%s669_s3 + $0x8] sm:$0xff] }
  0x61   :  { %v125_v48 = vpop.permute.xlu2 %124 }
  0x69   :  { %v120_v55 = vpop.permute.xlu2 %119 }
  0x71   :  { %v110_v60 = vpop.permute.xlu2 %109 }
  0x75   :  { %v55_v31 = vpop.permute.xlu0 %54 }
  0x78   :  { %v135_v46 = vpop.permute.xlu1 %134 }
  0x79   :  { %v100_v2 = vpop.permute.xlu2 %99 }
  0x80   :  { %v130_v51 = vpop.permute.xlu1 %129 }
  0x81   :  { %v90_v8 = vpop.permute.xlu2 %89 }
  0x82   :  { %v209_v33 = vpop.f32.mrf.mxu0 }
  0x83   :  { %v607_v34 = vadd.f32 %v209_v33, %v55_v31 }
  0x85   :  { %v261_v35 = vsel %vm260_vm1, %v607_v34, -inf }
  0x86   :  { %262 = vmax.xlane.f32.xlu0 %v261_v35 }
  0x88   :  { %v239_v36 = vpop.f32.mrf.mxu3  ;;  %v115_v58 = vpop.permute.xlu1 %114 }
  0x89   :  { %v230_v54 = vpop.f32.mrf.mxu2  ;;  %v80_v12 = vpop.permute.xlu2 %79 }
  0x8a   :  { %v623_v45 = vpop.f32.mrf.mxu0  ;;  %v231_v10 = vadd.f32 %v230_v54, %v90_v8 }
  0x90   :  { %v242_v38 = vpop.f32.mrf.mxu3  ;;  %v105_v1 = vpop.permute.xlu1 %104 }
  0x91   :  { %v233_v61 = vpop.f32.mrf.mxu2  ;;  %v243_v0 = vadd.f32 %v242_v38, %v110_v60  ;;  %v240_v3 = vadd.f32 %v239_v36, %v105_v1  ;;  %v75_v16 = vpop.permute.xlu2 %74 }
  0x92   :  { %v215_v49 = vpop.f32.mrf.mxu0 }
  0x98   :  { %v245_v40 = vpop.f32.mrf.mxu3  ;;  %v95_v7 = vpop.permute.xlu1 %94 }
  0x99   :  { %v246_v62 = vadd.f32 %v245_v40, %v115_v58  ;;  %v236_v4 = vpop.f32.mrf.mxu2  ;;  %v234_v9 = vadd.f32 %v233_v61, %v95_v7  ;;  %v65_v23 = vpop.permute.xlu2 %64 }
  0x9a   :  { %69 = vperm.xlu0 %455, %v38_v39   ;;  %v218_v57 = vpop.f32.mrf.mxu0  ;;  %v237_v5 = vadd.f32 %v236_v4, %v100_v2  ;;  %v216_v26 = vadd.f32 %v215_v49, %v65_v23 }
  0xa0   :  { %v248_v41 = vpop.f32.mrf.mxu3  ;;  %v85_v11 = vpop.permute.xlu1 %84 }
  0xa1   :  { %v249_v59 = vadd.f32 %v248_v41, %v120_v55  ;;  %v60_v27 = vpop.permute.xlu2 %59 }
  0xa2   :  { %v221_v63 = vpop.f32.mrf.mxu0  ;;  %v213_v28 = vadd.f32 %v623_v45, %v60_v27  ;;  %v373_v45 = vld [vmem:[%s669_s3] sm:$0xff] }
  0xa3   :  { %v222_v17 = vadd.f32 %v221_v63, %v75_v16 }
  0xa8   :  { %v251_v43 = vpop.f32.mrf.mxu3 }
  0xa9   :  { %v252_v56 = vadd.f32 %v251_v43, %v125_v48  ;;  %v375_v43 = vld [vmem:[%s669_s3 + $0x10] sm:$0xff] }
  0xaa   :  { %v224_v6 = vpop.f32.mrf.mxu0  ;;  %396 = vmatpush.msrb.mxu2 %v375_v43 }
  0xab   :  { %v225_v15 = vadd.f32 %v224_v6, %v80_v12 }
  0xac   :  { %397 = vmatpush.msrb.mxu2 %v374_v44 }
  0xae   :  { %398 = vmatpush.msrb.mxu2 %v373_v45 }
  0xb0   :  { %v254_v47 = vpop.f32.mrf.mxu3 }
  0xb1   :  { %v255_v53 = vadd.f32 %v254_v47, %v130_v51 }
  0xb2   :  { %v227_v13 = vpop.f32.mrf.mxu0 }
  0xb3   :  { %v228_v14 = vadd.f32 %v227_v13, %v85_v11 }
  0xb8   :  { %v257_v50 = vpop.f32.mrf.mxu3 }
  0xb9   :  { %v258_v52 = vadd.f32 %v257_v50, %v135_v46 }
  0xbb   :  { %431 = vmatpush.xpose.msk.msra.mxu1 %vm285_vm2, %v258_v52  ;;  %v458_v52 = vld [vmem:[%s669_s3 + $0x20] ss:$0 sm:$0xff] }
  0xbf   :  { %432 = vmatpush.xpose.msk.msra.mxu1 %vm285_vm2, %v255_v53 }
  0xc3   :  { %433 = vmatpush.xpose.msk.msra.mxu1 %vm285_vm2, %v252_v56 }
  0xc7   :  { %434 = vmatpush.xpose.msk.msra.mxu1 %vm285_vm2, %v249_v59 }
  0xcb   :  { %435 = vmatpush.xpose.msk.msra.mxu1 %vm285_vm2, %v246_v62 }
  0xcf   :  { %436 = vmatpush.xpose.msk.msra.mxu1 %vm285_vm2, %v243_v0 }
  0xd3   :  { %437 = vmatpush.xpose.msk.msra.mxu1 %vm285_vm2, %v240_v3 }
  0xd7   :  { %438 = vmatpush.xpose.msk.msra.mxu1 %vm285_vm2, %v237_v5 }
  0xdb   :  { %439 = vmatpush.xpose.msk.msra.mxu1 %vm285_vm2, %v234_v9 }
  0xdf   :  { %440 = vmatpush.xpose.msk.msra.mxu1 %vm285_vm2, %v231_v10 }
  0xe3   :  { %441 = vmatpush.xpose.msk.msra.mxu1 %vm285_vm2, %v228_v14 }
  0xe7   :  { %442 = vmatpush.xpose.msk.msra.mxu1 %vm285_vm2, %v225_v15 }
  0xeb   :  { %443 = vmatpush.xpose.msk.msra.mxu1 %vm285_vm2, %v222_v17 }
  0xf9   :  { %v263_v18 = vpop.xlane.xlu0 %262 }
  0xfa   :  { %v264_v19 = vsub.f32 %v607_v34, %v263_v18 }
  0xfc   :  { %v265_v20 = vmul.f32 1.442695, %v264_v19 }
  0xfe   :  { %459 = vpow2.f32 %v265_v20 }
 0x104   :  { %v460_v21 = vpop.eup %459 }
 0x105   :  { %v267_v22 = vsel %vm260_vm1, %v460_v21, 0.0 }
 0x106   :  { %268 = vadd.xlane.f32.xlu1 %v267_v22 }
 0x10c   :  { %v70_v24 = vpop.permute.xlu0 %69 }
 0x10d   :  { %v219_v25 = vadd.f32 %v218_v57, %v70_v24 }
 0x10f   :  { %444 = vmatpush.xpose.msk.msra.mxu1 %vm285_vm2, %v219_v25 }
 0x113   :  { %445 = vmatpush.xpose.msk.msra.mxu1 %vm285_vm2, %v216_v26 }
 0x117   :  { %446 = vmatpush.xpose.msk.msra.mxu1 %vm285_vm2, %v213_v28 }
 0x179   :  { %v269_v29 = vpop.xlane.xlu1 %268 }
 0x17a   :  { %461 = vrcp.f32 %v269_v29  ;;  %v281_v33 = vand.u32 2147483648, %v269_v29  ;;  %v279_v35 = vand.u32 2147483647, %v269_v29  ;;  %vm275_vm4 = vweird.f32 %v269_v29 }
 0x17c   :  { %v282_v37 = vor.u32 1.1754944e-38, %v281_v33  ;;  %vm280_vm6 = vcmp.eq.f32.partialorder %v279_v35, 8.507059e+37 }
 0x180   :  { %v462_v30 = vpop.eup %461 }
 0x181   :  { %v271_v31 = vmul.f32 %v462_v30, %v269_v29  ;;  %vm276_vm3 = vweird.f32 %v462_v30 }
 0x182   :  { %vm277_vm5 = vmor %vm275_vm4, %vm276_vm3 }
 0x183   :  { %v272_v32 = vsub.f32 1.0, %v271_v31 }
 0x185   :  { %v273_v34 = vmul.f32 %v462_v30, %v272_v32 }
 0x187   :  { %v274_v36 = vadd.f32 %v462_v30, %v273_v34 }
 0x189   :  { %v278_v38 = vsel %vm277_vm5, %v462_v30, %v274_v36 }
 0x18a   :  { %v283_v39 = vsel %vm280_vm6, %v282_v37, %v278_v38 }
 0x18b   :  { %v284_v40 = vmul.f32 %v460_v21, %v283_v39 }
 0x18d   :  { %447 = vmatmul.msk.f32.vlgmr.msra.gmra.mxu1 %vm285_vm2, %v284_v40 }
 0x20a   :  { %v354_v41 = vpop.f32.mrf.mxu1 }
 0x20b   :  { %361 = vrot.lane.b32.xlu2 %v354_v41, %s466_s2  ;;  %358 = vrot.lane.b32.xlu0 %v354_v41, %s467_s29 }
 0x213   :  { %364 = vrot.lane.b32.xlu0 %v354_v41, %s468_s30 }
 0x265   :  { %v362_v48 = vpop.permute.xlu2 %361 }
 0x27d   :  { %v359_v46 = vpop.permute.xlu0 %358 }
 0x27e   :  { %v368_v47 = vsel %vm367_vm7, %v354_v41, %v359_v46 }
 0x27f   :  { %v370_v49 = vsel %vm369_vm8, %v368_v47, %v362_v48 }
 0x285   :  { %v365_v50 = vpop.permute.xlu0 %364 }
 0x286   :  { %v372_v51 = vsel %vm371_vm9, %v370_v49, %v365_v50 }
 0x287   :  { %448 = vmatmul.msk.f32.vlgmr.msrb.gmra.mxu2 %vm379_vm10, %v372_v51 }
 0x30a   :  { %v400_v53 = vpop.f32.mrf.mxu2 }
 0x30b   :  { %v401_v54 = vadd.f32 %v458_v52, %v400_v53 }
 0x30d   :  { %404 = vst.msk [vmem:[%s670_s4] sm:$0xf] %vm403_vm11, %v401_v54  ;;  %v405_v55 = vmul.f32 1.442695, %v401_v54 }
 0x30f   :  { %463 = vpow2.f32 %v405_v55 }
 0x315   :  { %v464_v56 = vpop.eup %463 }
 0x316   :  { %408 = vst.msk [vmem:[%s670_s4] sm:$0xf] %vm407_vm12, %v464_v56 }

</bundles_post_ra>
